<compile_context>
chip_gen: v7x
topology: tpu7x:2x2x1
jax: 0.10.0
libtpu: 0.0.40
codegen_flags: <defaults>
</compile_context>

<pallas_src>
import math

import jax
import jax.numpy as jnp
from jax.experimental import pallas as pl
from jax.experimental.pallas import tpu as pltpu


def _drop_path_kernel(scale_ref, x_ref, o_ref):
    # scale_ref: (TB, 1) f32 in VMEM -- per-sample mask/keep_prob.
    # x_ref / o_ref: (TB, TN) in the input dtype.
    # Note: scale is cast to the input dtype (for bf16 inputs 1/keep_prob is
    # rounded to bf16, matching "multiply in input dtype" semantics).
    o_ref[...] = x_ref[...] * scale_ref[...].astype(o_ref.dtype)


def drop_path_pallas(x, drop_prob: float = 0.0, training: bool = False, key=None,
                     *, donate_input: bool = False):
    """DropPath forward. x: (B, ...) float array (e.g. NCHW)."""
    if drop_prob == 0.0 or not training:
        return x
    if key is None:
        raise ValueError(
            "drop_path_pallas: a PRNG `key` is required when training with drop_prob > 0 "
            "(reusing a fixed key would correlate masks across layers/steps)."
        )

    keep_prob = 1.0 - float(drop_prob)
    B = x.shape[0]
    N = int(math.prod(x.shape[1:]))
    itemsize = jnp.dtype(x.dtype).itemsize

    # --- per-sample Bernoulli(keep_prob) scale, computed in the wrapper -------
    u = jax.random.uniform(key, (B, 1), dtype=jnp.float32)      # [0, 1)
    mask = jnp.floor(keep_prob + u)                               # {0., 1.}
    scale = mask * (1.0 / keep_prob)                              # (B, 1) f32

    # --- flat 2D view, no padding ---------------------------------------------
    x2 = x.reshape(B, N)

    # --- tile sizing -----------------------------------------------------------
    # Batch rows per block: full (8,128) vreg density when possible.
    TB = B if B < 8 else 8
    # Lane extent per block: multiple of 128, ~2 MiB per buffer target.
    budget_bytes = 2 * 1024 * 1024
    tn_budget = max(128, (budget_bytes // (TB * itemsize)) // 128 * 128)
    if N % 128 == 0:
        TN = min(N, tn_budget)
    elif N <= tn_budget:
        TN = N                      # full extent (allowed even if not %128)
    else:
        TN = tn_budget              # multiple of 128; last block is partial

    nb_b = pl.cdiv(B, TB)
    nb_n = pl.cdiv(N, TN)
    # N-block axis first: it is (almost always) the larger axis, so megacore
    # sharding on v7x splits it across both TensorCores.
    grid = (nb_n, nb_b)

    cost = pl.CostEstimate(
        flops=B * N,
        transcendentals=0,
        bytes_accessed=2 * B * N * itemsize + B * 4,
    )

    extra_kwargs = {}
    if donate_input:
        # Alias x2 (input index 1) to the output; only worthwhile when the
        # caller no longer needs x (typical for residual-branch outputs).
        extra_kwargs["input_output_aliases"] = {1: 0}

    out2 = pl.pallas_call(
        _drop_path_kernel,
        out_shape=jax.ShapeDtypeStruct((B, N), x.dtype),
        grid=grid,
        in_specs=[
            pl.BlockSpec((TB, 1), lambda j, i: (i, 0)),     # scale
            pl.BlockSpec((TB, TN), lambda j, i: (i, j)),    # x
        ],
        out_specs=pl.BlockSpec((TB, TN), lambda j, i: (i, j)),
        compiler_params=pltpu.CompilerParams(
            dimension_semantics=("parallel", "parallel"),
        ),
        cost_estimate=cost,
        **extra_kwargs,
    )(scale, x2)

    return out2.reshape(x.shape)


class DropPath:
    """Mirror of the PyTorch module; no learnable parameters."""

    def __init__(self, drop_prob=None):
        self.drop_prob = drop_prob
        self.training = True

    def __call__(self, x, key=None):
        return drop_path_pallas(
            x,
            drop_prob=0.0 if self.drop_prob is None else self.drop_prob,
            training=self.training,
            key=key,
        )


if __name__ == "__main__":
    key = jax.random.PRNGKey(0)
    B, C, H, W = 2, 4, 16, 16
    x = jax.random.normal(key, (B, C, H, W), dtype=jnp.float32)

    module = DropPath(drop_prob=0.25)
    module.training = True

    out = module(x, key=jax.random.PRNGKey(1234))
    out = jax.block_until_ready(out)
    assert out.shape == x.shape and out.dtype == x.dtype

    # Semantics: each sample is either all-zero or x / keep_prob.
    keep_prob = 1.0 - 0.25
    for b in range(B):
        xb, ob = x[b], out[b]
        is_zero = bool(jnp.all(ob == 0.0))
        is_scaled = bool(jnp.allclose(ob, xb / keep_prob, rtol=1e-5, atol=1e-5))
        assert is_zero or is_scaled, "per-sample DropPath semantics violated"

    # Eval mode / drop_prob==0 must be identity (no kernel launch needed).
    module.training = False
    out_eval = jax.block_until_ready(module(x))
    assert bool(jnp.array_equal(out_eval, x))

    # Non-divisible N (ragged last lane-block) also works without padding.
    x_odd = jax.random.normal(key, (3, 5, 7, 11), dtype=jnp.float32)  # N = 385
    out_odd = jax.block_until_ready(
        drop_path_pallas(x_odd, drop_prob=0.5, training=True,
                         key=jax.random.PRNGKey(7))
    )
    kp = 0.5
    for b in range(x_odd.shape[0]):
        ob, xb = out_odd[b], x_odd[b]
        assert bool(jnp.all(ob == 0.0)) or bool(
            jnp.allclose(ob, xb / kp, rtol=1e-5, atol=1e-5)
        ), "ragged-N DropPath semantics violated"

    print("KERNEL_OK")
</pallas_src>

<mosaic_0001>
module attributes {stable_mosaic.version = 11 : i64} {
  func.func @_drop_path_kernel(%arg0: i32, %arg1: i32, %arg2: memref<2x1xf32, #tpu.memory_space<vmem>>, %arg3: memref<2x1024xf32, #tpu.memory_space<vmem>>, %arg4: memref<2x1024xf32, #tpu.memory_space<vmem>>) attributes {dimension_semantics = [#tpu.dimension_semantics<parallel>, #tpu.dimension_semantics<parallel>], iteration_bounds = array<i64: 1, 1>, scalar_prefetch = 0 : i64, scratch_operands = 0 : i64, tpu.core_type = #tpu.core_type<tc>, window_params = [{transform_indices = @transform_0, window_bounds = array<i64: 2, 1>}, {transform_indices = @transform_1, window_bounds = array<i64: 2, 1024>}, {transform_indices = @transform_2, window_bounds = array<i64: 2, 1024>}]} {
    %c0 = arith.constant 0 : index
    %c0_0 = arith.constant 0 : index
    %0 = vector.load %arg3[%c0, %c0_0] : memref<2x1024xf32, #tpu.memory_space<vmem>>, vector<2x1024xf32>
    %c0_1 = arith.constant 0 : index
    %c0_2 = arith.constant 0 : index
    %1 = vector.load %arg2[%c0_1, %c0_2] : memref<2x1xf32, #tpu.memory_space<vmem>>, vector<2x1xf32>
    %2 = vector.broadcast %1 : vector<2x1xf32> to vector<2x1024xf32>
    %3 = arith.mulf %0, %2 : vector<2x1024xf32>
    %c0_3 = arith.constant 0 : index
    %c0_4 = arith.constant 0 : index
    %4 = vector.load %arg4[%c0_3, %c0_4] : memref<2x1024xf32, #tpu.memory_space<vmem>>, vector<2x1024xf32>
    tpu.vector_store %arg4[%c0_3, %c0_4], %3 {strides = array<i32>} : memref<2x1024xf32, #tpu.memory_space<vmem>>, vector<2x1024xf32>,
    return
  }
  func.func @transform_0(%arg0: i32, %arg1: i32) -> (i32, i32) {
    %c0_i32 = arith.constant 0 : i32
    %c0_i32_0 = arith.constant 0 : i32
    return %arg1, %c0_i32 : i32, i32
  }
  func.func @transform_1(%arg0: i32, %arg1: i32) -> (i32, i32) {
    %c0_i32 = arith.constant 0 : i32
    return %arg1, %arg0 : i32, i32
  }
  func.func @transform_2(%arg0: i32, %arg1: i32) -> (i32, i32) {
    %c0_i32 = arith.constant 0 : i32
    return %arg1, %arg0 : i32, i32
  }
}

</mosaic_0001>

<bundles_post_ra>
// kernel: tpu_custom_call.1
= control target key start
LH: loop header
LB: loop body
LE: loop exit
PB: predicated region body
PF: predicated region fallthrough
CT: control target
= control target key end

     0   :  { %7 = vsyncpa [#allocation3], 0  ;;  %s157_s0 = inlined_call_operand.vmem [shape: f32[2,1], index: 0, kind: input, shape index: {}]   ;;  %s158_s1 = inlined_call_operand.hbm [shape: f32[2,1024], index: 1, kind: input, shape index: {}]   ;;  %s159_s2 = inlined_call_operand.hbm [shape: f32[2,1024], index: 2, kind: output, shape index: {}]  }
   0x1   :  { %8 = vsyncpa [#allocation4], 0  ;;  %s111_s9 = smov [#allocation2]   ;;  %s63_s13 = scalar_lea.hbm %s158_s1, 256 }
   0x2   :  { %s17_s10 = sshll.u32 %s111_s9, 4  ;;  %p64_p0 = scmp.ne.s32.totalorder %s158_s1, %s63_s13  ;;  %s18_s10 = int_to_ptr.vmem [resolvable:$true] %s17_s10 }
   0x3   :  { %p67_p1 = scmp.lt.u32.totalorder %s63_s13, %s158_s1 }
   0x5   :  { %p69_p2 = pnand %p67_p1, %p64_p0 }
   0x7   :  { %72 = shalt.err (!%p69_p2)
}
   0x8   :  { %s73_s18 = scalar_lea.vmem %s18_s10, 256  ;;  %p78_p4 = scmp.lt.s32.totalorder %s18_s10, %s18_s10 }
   0x9   :  { %p74_p3 = scmp.ne.s32.totalorder %s18_s10, %s73_s18  ;;  %p79_p5 = scmp.lt.s32.totalorder %s73_s18, %s73_s18 }
   0xb   :  { %p80_p6 = por %p79_p5, %p78_p4 }
   0xd   :  { %p81_p7 = pnand %p80_p6, %p74_p3 }
   0xf   :  { %84 = shalt.err (!%p81_p7)
}
  0x10   :  { %20 = dma.hbm_to_vmem [thread:$0]  %s158_s1, 256, %s18_s10, [#allocation3]  }
  0x11   :  { %107 = dma.done.wait [#allocation3], 256  }
  0x12   :  { %108 = vsyncadd [#allocation3], 4294967040  ;;  %v112_v0 = vmov 0   ;;  %v26_v1 = vld [vmem:[%s157_s0] sm:$0x3]  ;;  %v34_v4 = vlaneseq  ;;  %v25_v10 = vld [vmem:[#allocation2 + $0x8] sm:$0xff] }
  0x13   :  { %62 = vset.pattern.permute.xlu0 %v112_v0  ;;  %v113_v2 = vmov 269488144   ;;  %v24_v9 = vld [vmem:[#allocation2] sm:$0xff]  ;;  %s114_s23 = smov [#allocation5]  }
  0x14   :  { %29 = vperm.xlu0 %62, %v26_v1   ;;  %v32_v3 = vunpack.c.l.s4 %v113_v2  ;;  %v35_v6 = vshrl.u32 %v34_v4, 7  ;;  %s49_s1 = sshll.u32 %s114_s23, 4  ;;  %s50_s1 = int_to_ptr.vmem [resolvable:$true] %s49_s1 }
  0x15   :  { %s85_s24 = scalar_lea.vmem %s50_s1, 256  ;;  %p90_p9 = scmp.lt.s32.totalorder %s50_s1, %s50_s1 }
  0x16   :  { %v33_v5 = vunpack.c.0.s8 %v32_v3  ;;  %p86_p8 = scmp.ne.s32.totalorder %s50_s1, %s85_s24  ;;  %p91_p10 = scmp.lt.s32.totalorder %s85_s24, %s85_s24 }
  0x18   :  { %v36_v7 = vsub.s32 %v33_v5, %v35_v6  ;;  %p92_p11 = por %p91_p10, %p90_p9 }
  0x1a   :  { %p93_p12 = pnand %p92_p11, %p86_p8 }
  0x93   :  { %v30_v8 = vpop.permute.xlu0 %29 }
  0x94   :  { %v37_v11 = vrot.slane %v30_v8, %v36_v7 }
  0x96   :  { %v39_v12 = vmul.f32 %v37_v11, %v24_v9  ;;  %v40_v13 = vmul.f32 %v37_v11, %v25_v10 }
  0x98   :  { %41 = vst [vmem:[#allocation5] sm:$0xff] %v39_v12  ;;  %42 = vst [vmem:[#allocation5 + $0x8] sm:$0xff] %v40_v13 }
  0x99   :  { %96 = shalt.err (!%p93_p12)
}
  0x9a   :  { %s97_s26 = scalar_lea.hbm %s159_s2, 256 }
  0x9b   :  { %p98_p13 = scmp.ne.s32.totalorder %s159_s2, %s97_s26  ;;  %p101_p0 = scmp.lt.u32.totalorder %s97_s26, %s159_s2 }
  0x9d   :  { %p103_p1 = pnand %p101_p0, %p98_p13 }
  0x9f   :  { %106 = shalt.err (!%p103_p1)
}
  0xa0   :  { %52 = dma.vmem_to_hbm [thread:$0]  %s50_s1, 256, %s159_s2, [#allocation4]  }
  0xa1   :  { %109 = dma.done.wait [#allocation4], 256  }
  0xa2   :  { %110 = vsyncadd [#allocation4], 4294967040 }
  0xa3   :  { %56 = vsyncpa [#allocation3], 1 }
  0xa4   :  { %57 = vsyncpa [#allocation4], 1 }

</bundles_post_ra>
